<compile_context>
chip_gen: v7x
topology: tpu7x:2x2x1
jax: 0.10.0
libtpu: 0.0.40
codegen_flags: <defaults>
</compile_context>

<pallas_src>
from typing import Any, NamedTuple

import jax
import jax.numpy as jnp
from jax.experimental import pallas as pl
from jax.experimental.pallas import tpu as pltpu


# ---------------------------------------------------------------------------
# Kernel
# ---------------------------------------------------------------------------
def mlp_kernel(x_ref, w12_ref, b12_ref, wp_ref, bp_ref, o_ref, acc_ref):
    """One (row-tile i, hidden-tile k) step of the SwiGLU MLP.

    x_ref   : (tm, D)    bf16  row tile of the input
    w12_ref : (D, 2*th)  bf16  fused [w1_k | w2_k] columns for hidden tile k
    b12_ref : (1, 2*th)  f32   fused [b1_k | b2_k]
    wp_ref  : (th, D)    bf16  c_proj rows for hidden tile k
    bp_ref  : (1, D)     f32   c_proj bias
    o_ref   : (tm, D)          output row tile (written at last k)
    acc_ref : (tm, D)    f32   VMEM accumulator over hidden tiles
    """
    k = pl.program_id(1)
    nk = pl.num_programs(1)

    @pl.when(k == 0)
    def _():
        acc_ref[...] = jnp.zeros_like(acc_ref)

    th = wp_ref.shape[0]

    # Fused up-projection: one MXU matmul with N = 2*th, f32 accumulation.
    x12 = jnp.dot(x_ref[...], w12_ref[...],
                  preferred_element_type=jnp.float32) + b12_ref[...]
    x1 = x12[:, :th]
    x2 = x12[:, th:]

    # silu(x1) * x2 in f32 (matches the autocast(enabled=False) region).
    hidden = (x1 * jax.nn.sigmoid(x1)) * x2                       # (tm, th) f32

    # Down-projection for this hidden tile, accumulated in f32.
    acc_ref[...] += jnp.dot(hidden.astype(wp_ref.dtype), wp_ref[...],
                            preferred_element_type=jnp.float32)

    @pl.when(k == nk - 1)
    def _():
        o_ref[...] = (acc_ref[...] + bp_ref[...]).astype(o_ref.dtype)


# ---------------------------------------------------------------------------
# Planning helpers (per device generation / per model config; not per call)
# ---------------------------------------------------------------------------
def _round_up(x, m):
    return (x + m - 1) // m * m


def _tpu_generation():
    """Best-effort (vmem_bytes, device_kind) query with safe defaults."""
    vmem = 128 * 1024 * 1024
    kind = ""
    try:
        vmem = int(pltpu.get_tpu_info().vmem_capacity_bytes)
    except Exception:
        pass
    try:
        kind = jax.devices()[0].device_kind.lower()
    except Exception:
        pass
    return vmem, kind


def _working_set_bytes(tm, th, D, cdt_size, out_size):
    """Double-buffered tiles + f32 accumulator + in-kernel f32 temporaries."""
    return (2 * (D * 2 * th) * cdt_size        # w12 (double-buffered)
            + 2 * (th * D) * cdt_size          # wp  (double-buffered)
            + 2 * (tm * D) * cdt_size          # x row tiles
            + 2 * (tm * D) * out_size          # out row tiles
            + (tm * D) * 4                     # f32 accumulator
            + tm * 3 * th * 4                  # x12 (tm,2th) + hidden (tm,th) f32
            + 2 * 2 * th * 4 + 2 * D * 4)      # biases


class MLPPlan(NamedTuple):
    th: int
    n_h: int
    tm_target: int
    vmem_limit: int
    is_v7: bool
    compute_dtype: Any
    D: int
    H: int


def plan_mlp(D, H, *, out_itemsize=4, compute_dtype=jnp.bfloat16):
    """Pick hidden tile, row-tile target and VMEM limit for the current TPU."""
    vmem_cap, kind = _tpu_generation()
    is_v7 = ("v7" in kind) or (vmem_cap <= 96 * 2 ** 20)
    is_v5 = ("v5" in kind) and not is_v7

    # Arithmetic intensity w.r.t. streamed weights == tm flops/byte.
    # Ridge points: v5e ~240, v6e ~680, v7x ~311 -> pick tm above the ridge.
    if is_v7:
        tm_target, th_target = 512, 256
        vmem_limit = min(vmem_cap - 8 * 2 ** 20, 52 * 2 ** 20)
    elif is_v5:
        tm_target, th_target = 512, 512
        vmem_limit = min(vmem_cap - 16 * 2 ** 20, 112 * 2 ** 20)
    else:  # v6e / unknown 128-MiB-class default
        tm_target, th_target = 1024, 256
        vmem_limit = min(vmem_cap - 16 * 2 ** 20, 100 * 2 ** 20)

    # Hidden tile: lane-dense divisor of H.
    if H % th_target == 0:
        th = th_target
    else:
        th = next((c for c in (512, 384, 256, 128) if c <= H and H % c == 0), H)
    th = min(th, H)
    # TODO(synk): if H is large and not a multiple of 128, th falls back to H
    # (full-dim exception) — correct but layout-padded and VMEM-hungry.

    cdt_size = jnp.dtype(compute_dtype).itemsize

    # Shrink th first (bounds in-kernel f32 temporaries), then tm, until the
    # double-buffered working set fits the per-generation VMEM budget.
    for _ in range(16):
        if _working_set_bytes(tm_target, th, D, cdt_size, out_itemsize) <= vmem_limit:
            break
        if th > 128 and H % (th // 2) == 0:
            th //= 2
        elif tm_target > 128:
            tm_target = max(128, tm_target // 2)
        else:
            break

    return MLPPlan(th=th, n_h=H // th, tm_target=tm_target,
                   vmem_limit=int(vmem_limit), is_v7=is_v7,
                   compute_dtype=compute_dtype, D=D, H=H)


def prepare_mlp_params(w1, b1, w2, b2, wp, bp, plan):
    """One-time weight layout prep (hoisted out of the per-call forward path).

    Fuses w1|w2 column-wise per hidden tile so the up-projection is a single
    wide matmul per grid step, and casts weights to the compute dtype once.
    """
    D, H = w1.shape
    th, n_h, cdt = plan.th, plan.n_h, plan.compute_dtype
    w12 = jnp.concatenate(
        [w1.reshape(D, n_h, th), w2.reshape(D, n_h, th)], axis=2
    ).reshape(D, 2 * H).astype(cdt)
    b12 = jnp.concatenate(
        [b1.reshape(1, n_h, th), b2.reshape(1, n_h, th)], axis=2
    ).reshape(1, 2 * H).astype(jnp.float32)
    return (w12, b12, wp.astype(cdt), bp.astype(jnp.float32))


# ---------------------------------------------------------------------------
# Forward
# ---------------------------------------------------------------------------
def mlp_forward(x, prepared, plan):
    """x: [B, T, D]; prepared = prepare_mlp_params(...); plan = plan_mlp(D, H)."""
    w12, b12, wp_c, bp_c = prepared
    B, T, D = x.shape
    H, th, n_h = plan.H, plan.th, plan.n_h
    M = B * T
    out_dtype = x.dtype
    cdt = plan.compute_dtype
    cdt_size = jnp.dtype(cdt).itemsize
    out_size = jnp.dtype(out_dtype).itemsize

    # ---- per-call row tile: minimize padding waste --------------------------
    if M <= plan.tm_target:
        tm = _round_up(M, 8)
    else:
        cands = range(128, plan.tm_target + 1, 128)
        tm = min(cands, key=lambda c: (_round_up(M, c) - M, -c))
    # v7x megacore: keep >= 2 steps on the 'parallel' row axis so both TCs work.
    if plan.is_v7 and M > 256 and _round_up(M, tm) // tm < 2:
        tm = _round_up((M + 1) // 2, 8)
    M_pad = _round_up(M, tm)
    n_row = M_pad // tm

    # ---- per-call activation prep (weights were prepared once, outside) -----
    x2d = x.reshape(M, D)
    if M_pad != M:
        x2d = jnp.pad(x2d, ((0, M_pad - M), (0, 0)))
    x2d = x2d.astype(cdt)

    # ---- cost estimate: weights are re-streamed once per row tile -----------
    weight_bytes = (D * 2 * H + H * D) * cdt_size + (2 * H + D) * 4
    cost = pl.CostEstimate(
        flops=6 * M_pad * D * H,                 # 2*M*D*(2H) + 2*M*H*D
        transcendentals=M_pad * H,               # sigmoid
        bytes_accessed=(M_pad * D * cdt_size     # x
                        + n_row * weight_bytes   # weights per row tile
                        + M_pad * D * out_size), # out
    )

    # Single-row-tile shapes are inherently weight-DMA-latency bound: deepen
    # pipelining on the weight streams if VMEM headroom allows.
    extra_buf = (D * 2 * th + th * D) * cdt_size
    wspec_kw = {}
    if (n_row == 1 and n_h >= 4 and
            _working_set_bytes(tm, th, D, cdt_size, out_size) + extra_buf
            <= plan.vmem_limit):
        wspec_kw = dict(pipeline_mode=pl.Buffered(3))

    grid = (n_row, n_h)
    out2d = pl.pallas_call(
        mlp_kernel,
        out_shape=jax.ShapeDtypeStruct((M_pad, D), out_dtype),
        grid_spec=pltpu.PrefetchScalarGridSpec(
            num_scalar_prefetch=0,
            grid=grid,
            in_specs=[
                pl.BlockSpec((tm, D), lambda i, k: (i, 0)),                 # x tile
                pl.BlockSpec((D, 2 * th), lambda i, k: (0, k), **wspec_kw), # w1|w2 tile
                pl.BlockSpec((1, 2 * th), lambda i, k: (0, k)),             # b1|b2 tile
                pl.BlockSpec((th, D), lambda i, k: (k, 0), **wspec_kw),     # c_proj tile
                pl.BlockSpec((1, D), lambda i, k: (0, 0)),                  # c_proj bias
            ],
            out_specs=pl.BlockSpec((tm, D), lambda i, k: (i, 0)),
            scratch_shapes=[pltpu.VMEM((tm, D), jnp.float32)],              # f32 acc
        ),
        compiler_params=pltpu.CompilerParams(
            dimension_semantics=("parallel", "arbitrary"),
            vmem_limit_bytes=plan.vmem_limit,
        ),
        cost_estimate=cost,
    )(x2d, w12, b12, wp_c, bp_c)

    return out2d[:M].reshape(B, T, D)


# ---------------------------------------------------------------------------
# Init + smoke test
# ---------------------------------------------------------------------------
def init_params(key, n_embd):
    """Deterministic init mimicking nn.Linear (uniform +-1/sqrt(fan_in))."""
    hidden_dim = 2 * n_embd
    ks = jax.random.split(key, 6)
    bnd1 = 1.0 / (n_embd ** 0.5)
    bnd2 = 1.0 / (hidden_dim ** 0.5)
    w1 = jax.random.uniform(ks[0], (n_embd, hidden_dim), jnp.float32, -bnd1, bnd1)
    b1 = jax.random.uniform(ks[1], (1, hidden_dim), jnp.float32, -bnd1, bnd1)
    w2 = jax.random.uniform(ks[2], (n_embd, hidden_dim), jnp.float32, -bnd1, bnd1)
    b2 = jax.random.uniform(ks[3], (1, hidden_dim), jnp.float32, -bnd1, bnd1)
    wp = jax.random.uniform(ks[4], (hidden_dim, n_embd), jnp.float32, -bnd2, bnd2)
    bp = jax.random.uniform(ks[5], (1, n_embd), jnp.float32, -bnd2, bnd2)
    return w1, b1, w2, b2, wp, bp


if __name__ == "__main__":
    # Small config: batch=2, seq=8, n_embd=32 -> hidden_dim=64
    B, T, n_embd = 2, 8, 32
    hidden_dim = 2 * n_embd
    key = jax.random.PRNGKey(0)
    kx, kp = jax.random.split(key)
    x = jax.random.normal(kx, (B, T, n_embd), jnp.float32)
    w1, b1, w2, b2, wp, bp = init_params(kp, n_embd)

    # One-time plan + weight prep, hoisted out of the per-call forward path.
    plan = plan_mlp(n_embd, hidden_dim, out_itemsize=jnp.dtype(x.dtype).itemsize)
    prepared = prepare_mlp_params(w1, b1, w2, b2, wp, bp, plan)

    out = mlp_forward(x, prepared, plan)
    jax.block_until_ready(out)

    # Reference mirroring the kernel's bf16-operand / f32-accumulation numerics.
    f32 = jnp.float32
    bf = lambda a: a.astype(jnp.bfloat16).astype(f32)
    x2d = bf(x.reshape(-1, n_embd))
    x1 = x2d @ bf(w1) + b1
    x2 = x2d @ bf(w2) + b2
    hidden = bf((x1 * jax.nn.sigmoid(x1)) * x2)
    ref = (hidden @ bf(wp) + bp).reshape(B, T, n_embd)
    assert jnp.allclose(out, ref, atol=1e-3, rtol=1e-3), "mismatch vs reference"

    # Sanity vs. the exact f32 math (bf16 rounding only), looser tolerance.
    x2d_f = x.reshape(-1, n_embd)
    x1f = x2d_f @ w1 + b1
    x2f = x2d_f @ w2 + b2
    ref_f32 = (((x1f * jax.nn.sigmoid(x1f)) * x2f) @ wp + bp).reshape(B, T, n_embd)
    assert jnp.allclose(out, ref_f32, atol=5e-2, rtol=5e-2), "bf16 drift too large"

    print("KERNEL_OK")
</pallas_src>

<mosaic_0001>
module attributes {stable_mosaic.version = 11 : i64} {
  func.func @mlp_kernel(%arg0: i32, %arg1: i32, %arg2: memref<16x32xbf16, #tpu.memory_space<vmem>>, %arg3: memref<32x128xbf16, #tpu.memory_space<vmem>>, %arg4: memref<1x128xf32, #tpu.memory_space<vmem>>, %arg5: memref<64x32xbf16, #tpu.memory_space<vmem>>, %arg6: memref<1x32xf32, #tpu.memory_space<vmem>>, %arg7: memref<16x32xf32, #tpu.memory_space<vmem>>, %arg8: memref<16x32xf32, #tpu.memory_space<vmem>>) attributes {dimension_semantics = [#tpu.dimension_semantics<parallel>, #tpu.dimension_semantics<arbitrary>], iteration_bounds = array<i64: 1, 1>, scalar_prefetch = 0 : i64, scratch_operands = 1 : i64, tpu.core_type = #tpu.core_type<tc>, window_params = [{transform_indices = @transform_0, window_bounds = array<i64: 16, 32>}, {transform_indices = @transform_1, window_bounds = array<i64: 32, 128>}, {transform_indices = @transform_2, window_bounds = array<i64: 1, 128>}, {transform_indices = @transform_3, window_bounds = array<i64: 64, 32>}, {pipeline_mode = #tpu.pipeline_mode<synchronous>, transform_indices = @transform_4, window_bounds = array<i64: 1, 32>}, {transform_indices = @transform_5, window_bounds = array<i64: 16, 32>}]} {
    %c0_i32 = arith.constant 0 : i32
    %0 = arith.cmpi eq, %arg1, %c0_i32 : i32
    %1 = arith.extui %0 : i1 to i32
    %c0_i32_0 = arith.constant 0 : i32
    %2 = arith.cmpi ne, %1, %c0_i32_0 : i32
    scf.if %2 {
      %cst_16 = arith.constant 0.000000e+00 : f32
      %27 = vector.broadcast %cst_16 : f32 to vector<16x32xf32>
      %c0_17 = arith.constant 0 : index
      %c0_18 = arith.constant 0 : index
      %28 = vector.load %arg8[%c0_17, %c0_18] : memref<16x32xf32, #tpu.memory_space<vmem>>, vector<16x32xf32>
      tpu.vector_store %arg8[%c0_17, %c0_18], %27 {strides = array<i32>} : memref<16x32xf32, #tpu.memory_space<vmem>>, vector<16x32xf32>,
    } else {
    }
    %c0 = arith.constant 0 : index
    %c0_1 = arith.constant 0 : index
    %3 = vector.load %arg2[%c0, %c0_1] : memref<16x32xbf16, #tpu.memory_space<vmem>>, vector<16x32xbf16>
    %c0_2 = arith.constant 0 : index
    %c0_3 = arith.constant 0 : index
    %4 = vector.load %arg3[%c0_2, %c0_3] : memref<32x128xbf16, #tpu.memory_space<vmem>>, vector<32x128xbf16>
    %cst = arith.constant dense<0.000000e+00> : vector<16x128xf32>
    %5 = tpu.matmul %3, %4, %cst {dimension_numbers = #tpu.dot_dimension_numbers<[1], [0], [0], [1], [0, 0, 1, 1], [], []>} : vector<16x32xbf16>, vector<32x128xbf16>, vector<16x128xf32> -> vector<16x128xf32>
    %c0_4 = arith.constant 0 : index
    %c0_5 = arith.constant 0 : index
    %6 = vector.load %arg4[%c0_4, %c0_5] : memref<1x128xf32, #tpu.memory_space<vmem>>, vector<1x128xf32>
    %7 = vector.broadcast %6 : vector<1x128xf32> to vector<16x128xf32>
    %8 = arith.addf %5, %7 : vector<16x128xf32>
    %9 = vector.extract_strided_slice %8 {offsets = [0, 0], sizes = [16, 64], strides = [1, 1]} : vector<16x128xf32> to vector<16x64xf32>
    %10 = vector.extract_strided_slice %8 {offsets = [0, 64], sizes = [16, 64], strides = [1, 1]} : vector<16x128xf32> to vector<16x64xf32>
    %11 = arith.negf %9 : vector<16x64xf32>
    %12 = math.exp %11 : vector<16x64xf32>
    %cst_6 = arith.constant 1.000000e+00 : f32
    %13 = vector.broadcast %cst_6 : f32 to vector<16x64xf32>
    %14 = arith.addf %13, %12 : vector<16x64xf32>
    %15 = arith.divf %13, %14 : vector<16x64xf32>
    %16 = arith.mulf %9, %15 : vector<16x64xf32>
    %17 = arith.mulf %16, %10 : vector<16x64xf32>
    %c0_7 = arith.constant 0 : index
    %c0_8 = arith.constant 0 : index
    %18 = vector.load %arg8[%c0_7, %c0_8] : memref<16x32xf32, #tpu.memory_space<vmem>>, vector<16x32xf32>
    %19 = arith.truncf %17 : vector<16x64xf32> to vector<16x64xbf16>
    %c0_9 = arith.constant 0 : index
    %c0_10 = arith.constant 0 : index
    %20 = vector.load %arg5[%c0_9, %c0_10] : memref<64x32xbf16, #tpu.memory_space<vmem>>, vector<64x32xbf16>
    %cst_11 = arith.constant dense<0.000000e+00> : vector<16x32xf32>
    %21 = tpu.matmul %19, %20, %cst_11 {dimension_numbers = #tpu.dot_dimension_numbers<[1], [0], [0], [1], [0, 0, 1, 1], [], []>} : vector<16x64xbf16>, vector<64x32xbf16>, vector<16x32xf32> -> vector<16x32xf32>
    %22 = arith.addf %18, %21 : vector<16x32xf32>
    %c0_12 = arith.constant 0 : index
    %c0_13 = arith.constant 0 : index
    %23 = vector.load %arg8[%c0_12, %c0_13] : memref<16x32xf32, #tpu.memory_space<vmem>>, vector<16x32xf32>
    tpu.vector_store %arg8[%c0_12, %c0_13], %22 {strides = array<i32>} : memref<16x32xf32, #tpu.memory_space<vmem>>, vector<16x32xf32>,
    %c0_i32_14 = arith.constant 0 : i32
    %24 = arith.cmpi eq, %arg1, %c0_i32_14 : i32
    %25 = arith.extui %24 : i1 to i32
    %c0_i32_15 = arith.constant 0 : i32
    %26 = arith.cmpi ne, %25, %c0_i32_15 : i32
    scf.if %26 {
      %c0_16 = arith.constant 0 : index
      %c0_17 = arith.constant 0 : index
      %27 = vector.load %arg8[%c0_16, %c0_17] : memref<16x32xf32, #tpu.memory_space<vmem>>, vector<16x32xf32>
      %c0_18 = arith.constant 0 : index
      %c0_19 = arith.constant 0 : index
      %28 = vector.load %arg6[%c0_18, %c0_19] : memref<1x32xf32, #tpu.memory_space<vmem>>, vector<1x32xf32>
      %29 = vector.broadcast %28 : vector<1x32xf32> to vector<16x32xf32>
      %30 = arith.addf %27, %29 : vector<16x32xf32>
      %c0_20 = arith.constant 0 : index
      %c0_21 = arith.constant 0 : index
      %31 = vector.load %arg7[%c0_20, %c0_21] : memref<16x32xf32, #tpu.memory_space<vmem>>, vector<16x32xf32>
      tpu.vector_store %arg7[%c0_20, %c0_21], %30 {strides = array<i32>} : memref<16x32xf32, #tpu.memory_space<vmem>>, vector<16x32xf32>,
    } else {
    }
    return
  }
  func.func @transform_0(%arg0: i32, %arg1: i32) -> (i32, i32) {
    %c0_i32 = arith.constant 0 : i32
    %c0_i32_0 = arith.constant 0 : i32
    return %arg0, %c0_i32 : i32, i32
  }
  func.func @transform_1(%arg0: i32, %arg1: i32) -> (i32, i32) {
    %c0_i32 = arith.constant 0 : i32
    %c0_i32_0 = arith.constant 0 : i32
    return %c0_i32, %arg1 : i32, i32
  }
  func.func @transform_2(%arg0: i32, %arg1: i32) -> (i32, i32) {
    %c0_i32 = arith.constant 0 : i32
    %c0_i32_0 = arith.constant 0 : i32
    return %c0_i32, %arg1 : i32, i32
  }
  func.func @transform_3(%arg0: i32, %arg1: i32) -> (i32, i32) {
    %c0_i32 = arith.constant 0 : i32
    %c0_i32_0 = arith.constant 0 : i32
    return %arg1, %c0_i32 : i32, i32
  }
  func.func @transform_4(%arg0: i32, %arg1: i32) -> (i32, i32) {
    %c0_i32 = arith.constant 0 : i32
    %c0_i32_0 = arith.constant 0 : i32
    %c0_i32_1 = arith.constant 0 : i32
    return %c0_i32, %c0_i32_0 : i32, i32
  }
  func.func @transform_5(%arg0: i32, %arg1: i32) -> (i32, i32) {
    %c0_i32 = arith.constant 0 : i32
    %c0_i32_0 = arith.constant 0 : i32
    return %arg0, %c0_i32 : i32, i32
  }
}

</mosaic_0001>

<bundles_post_ra>
// kernel: tpu_custom_call.1
= control target key start
LH: loop header
LB: loop body
LE: loop exit
PB: predicated region body
PF: predicated region fallthrough
CT: control target
= control target key end

     0   :  { %10 = vsyncpa [#allocation4], 0  ;;  %s658_s0 = inlined_call_operand.hbm [shape: bf16[16,32], index: 0, kind: input, shape index: {}]   ;;  %s659_s1 = inlined_call_operand.hbm [shape: bf16[32,128], index: 1, kind: input, shape index: {}]   ;;  %s660_s2 = inlined_call_operand.hbm [shape: f32[1,128], index: 2, kind: input, shape index: {}]   ;;  %s661_s3 = inlined_call_operand.hbm [shape: bf16[64,32], index: 3, kind: input, shape index: {}]   ;;  %s662_s4 = inlined_call_operand.hbm [shape: f32[1,32], index: 4, kind: input, shape index: {}]   ;;  %s663_s5 = inlined_call_operand.hbm [shape: f32[16,32], index: 5, kind: output, shape index: {}]  }
   0x1   :  { %11 = vsyncpa [#allocation7], 0 }
   0x2   :  { %12 = vsyncpa [#allocation10], 0 }
   0x3   :  { %13 = vsyncpa [#allocation5], 0  ;;  %s519_s18 = smov [#allocation6]   ;;  %s520_s20 = smov [#allocation9]  }
   0x4   :  { %s31_s19 = sshll.u32 %s519_s18, 4  ;;  %s53_s21 = sshll.u32 %s520_s20, 4  ;;  %s32_s19 = int_to_ptr.vmem [resolvable:$true] %s31_s19  ;;  %s561_s21 = int_to_ptr.vmem [resolvable:$true] %s53_s21 }
   0x5   :  { %s379_s24 = scalar_lea.hbm %s659_s1, 256 }
   0x6   :  { %p380_p0 = scmp.ne.s32.totalorder %s659_s1, %s379_s24  ;;  %p383_p1 = scmp.lt.u32.totalorder %s379_s24, %s659_s1 }
   0x8   :  { %p385_p2 = pnand %p383_p1, %p380_p0 }
   0xa   :  { %388 = shalt.err (!%p385_p2)
}
   0xb   :  { %s389_s29 = scalar_lea.vmem %s32_s19, 256  ;;  %p394_p4 = scmp.lt.s32.totalorder %s32_s19, %s32_s19 }
   0xc   :  { %p390_p3 = scmp.ne.s32.totalorder %s32_s19, %s389_s29  ;;  %p395_p5 = scmp.lt.s32.totalorder %s389_s29, %s389_s29 }
   0xe   :  { %p396_p6 = por %p395_p5, %p394_p4 }
  0x10   :  { %p397_p7 = pnand %p396_p6, %p390_p3 }
  0x12   :  { %400 = shalt.err (!%p397_p7)
}
  0x13   :  { %s521_s30 = smov 64   ;;  %s522_s6 = smov 4  }
  0x14   :  { %37 = dma.hbm_to_vmem [thread:$0]  %s659_s1, 256, %s32_s19, [#allocation7], %s521_s30, %s521_s30, %s522_s6  }
  0x15   :  { %s401_s11 = scalar_lea.hbm %s661_s3, 512 }
  0x16   :  { %p402_p8 = scmp.ne.s32.totalorder %s661_s3, %s401_s11  ;;  %p405_p9 = scmp.lt.u32.totalorder %s401_s11, %s661_s3 }
  0x18   :  { %p407_p10 = pnand %p405_p9, %p402_p8 }
  0x1a   :  { %410 = shalt.err (!%p407_p10)
}
  0x1b   :  { %s411_s16 = scalar_lea.vmem %s561_s21, 512  ;;  %p416_p12 = scmp.lt.s32.totalorder %s561_s21, %s561_s21 }
  0x1c   :  { %p412_p11 = scmp.ne.s32.totalorder %s561_s21, %s411_s16  ;;  %p417_p13 = scmp.lt.s32.totalorder %s411_s16, %s411_s16 }
  0x1e   :  { %p418_p0 = por %p417_p13, %p416_p12 }
  0x20   :  { %p419_p1 = pnand %p418_p0, %p412_p11 }
  0x22   :  { %422 = shalt.err (!%p419_p1)
}
  0x23   :  { %59 = dma.hbm_to_vmem [thread:$0]  %s661_s3, 512, %s561_s21, [#allocation10], %s521_s30, %s521_s30, %s522_s6  }
  0x24   :  { %s523_s18 = smov [#allocation3]   ;;  %s524_s20 = smov [#allocation8]  }
  0x25   :  { %s19_s19 = sshll.u32 %s523_s18, 4  ;;  %s44_s22 = sshll.u32 %s524_s20, 4  ;;  %s20_s19 = int_to_ptr.vmem [resolvable:$true] %s19_s19  ;;  %s45_s22 = int_to_ptr.vmem [resolvable:$true] %s44_s22 }
  0x26   :  { %s423_s25 = scalar_lea.hbm %s658_s0, 128 }
  0x27   :  { %p424_p2 = scmp.ne.s32.totalorder %s658_s0, %s423_s25  ;;  %p427_p3 = scmp.lt.u32.totalorder %s423_s25, %s658_s0 }
  0x29   :  { %p429_p4 = pnand %p427_p3, %p424_p2 }
  0x2b   :  { %432 = shalt.err (!%p429_p4)
}
  0x2c   :  { %s433_s3 = scalar_lea.vmem %s20_s19, 128  ;;  %p438_p6 = scmp.lt.s32.totalorder %s20_s19, %s20_s19 }
  0x2d   :  { %p434_p5 = scmp.ne.s32.totalorder %s20_s19, %s433_s3  ;;  %p439_p7 = scmp.lt.s32.totalorder %s433_s3, %s433_s3 }
  0x2f   :  { %p440_p8 = por %p439_p7, %p438_p6 }
  0x31   :  { %p441_p9 = pnand %p440_p8, %p434_p5 }
  0x33   :  { %444 = shalt.err (!%p441_p9)
}
  0x34   :  { %25 = dma.hbm_to_vmem [thread:$0]  %s658_s0, 128, %s20_s19, [#allocation4], %s521_s30, %s521_s30, %s522_s6  }
  0x35   :  { %s445_s10 = scalar_lea.hbm %s660_s2, 16 }
  0x36   :  { %p446_p10 = scmp.ne.s32.totalorder %s660_s2, %s445_s10  ;;  %p449_p11 = scmp.lt.u32.totalorder %s445_s10, %s660_s2 }
  0x38   :  { %p451_p12 = pnand %p449_p11, %p446_p10 }
  0x3a   :  { %454 = shalt.err (!%p451_p12)
}
  0x3b   :  { %s455_s15 = scalar_lea.vmem %s45_s22, 16  ;;  %s459_s16 = scalar_lea.vmem %s45_s22, 32 }
  0x3c   :  { %p456_p13 = scmp.ne.s32.totalorder %s45_s22, %s455_s15  ;;  %p460_p0 = scmp.lt.s32.totalorder %s45_s22, %s45_s22 }
  0x3d   :  { %p461_p1 = scmp.lt.s32.totalorder %s459_s16, %s455_s15 }
  0x3f   :  { %p462_p2 = por %p461_p1, %p460_p0 }
  0x41   :  { %p463_p3 = pnand %p462_p2, %p456_p13 }
  0x43   :  { %466 = shalt.err (!%p463_p3)
}
  0x44   :  { %47 = dma.hbm_to_vmem [thread:$0]  %s660_s2, 16, %s45_s22, [#allocation7]  }
  0x45   :  { %s525_s1 = smov [#allocation11]   ;;  %s467_s20 = scalar_lea.hbm %s662_s4, 16 }
  0x46   :  { %s66_s17 = sshll.u32 %s525_s1, 4  ;;  %p468_p4 = scmp.ne.s32.totalorder %s662_s4, %s467_s20  ;;  %s67_s17 = int_to_ptr.vmem [resolvable:$true] %s66_s17 }
  0x47   :  { %p471_p5 = scmp.lt.u32.totalorder %s467_s20, %s662_s4 }
  0x49   :  { %p473_p6 = pnand %p471_p5, %p468_p4 }
  0x4b   :  { %476 = shalt.err (!%p473_p6)
}
  0x4c   :  { %s477_s27 = scalar_lea.vmem %s67_s17, 16  ;;  %s481_s2 = scalar_lea.vmem %s67_s17, 32 }
  0x4d   :  { %p478_p7 = scmp.ne.s32.totalorder %s67_s17, %s477_s27  ;;  %p482_p8 = scmp.lt.s32.totalorder %s67_s17, %s67_s17 }
  0x4e   :  { %p483_p9 = scmp.lt.s32.totalorder %s481_s2, %s477_s27 }
  0x50   :  { %p484_p10 = por %p483_p9, %p482_p8 }
  0x52   :  { %p485_p11 = pnand %p484_p10, %p478_p7 }
  0x54   :  { %488 = shalt.err (!%p485_p11)
}
  0x55   :  { %69 = dma.hbm_to_vmem [thread:$0]  %s662_s4, 16, %s67_s17, [#allocation10]  }
  0x56   :  { %511 = dma.done.wait [#allocation4], 128  }
  0x57   :  { %512 = vsyncadd [#allocation4], 4294967168 }
  0x58   :  { %513 = dma.done.wait [#allocation7], 272  }
  0x59   :  { %514 = vsyncadd [#allocation7], 4294967024 }
  0x5a   :  { %515 = dma.done.wait [#allocation10], 528  }
  0x5b   :  { %516 = vsyncadd [#allocation10], 4294966768  ;;  %vm90_vm0 = vcmask 261120   ;;  %v526_v0 = vmov 0.0   ;;  %vm527_vm1 = vmmov 0   ;;  %v364_v1 = vld [vmem:[#allocation6] sm:$0xff]  }
  0x5c   :  { %332 = vmatprep.subr.bf16.mxu0 %v526_v0  ;;  %336 = vmatprep.mubr.msk.bf16.mxu0 %vm527_vm1, %v526_v0  ;;  %91 = vst.msk [vmem:[#allocation2] sm:$0xff] %vm90_vm0, %v526_v0  ;;  %92 = vst.msk [vmem:[#allocation2 + $0x8] sm:$0xff] %vm90_vm0, %v526_v0  ;;  %v365_v2 = vld [vmem:[#allocation6 + $0x8] sm:$0xff]   ;;  %v366_v3 = vld [vmem:[#allocation3] sm:$0xff]   ;;  %vm227_vm2 = vcmask 523264   ;;  %s528_s4 = smov [#allocation12]  }
  0x5d   :  { %340 = vmatprep.subr.bf16.mxu1 %v526_v0  ;;  %348 = vmatprep.mubr.msk.bf16.mxu1 %vm527_vm1, %v526_v0  ;;  %v367_v4 = vld [vmem:[#allocation9] sm:$0xff]   ;;  %v368_v5 = vld [vmem:[#allocation9 + $0x8] sm:$0xff]   ;;  %v369_v6 = vld [vmem:[#allocation9 + $0x10] sm:$0xff]  }
  0x5e   :  { %333 = vmatpush3.bf16.msra.mxu0 %v364_v1  ;;  %341 = vmatpush3.bf16.msra.mxu1 %v367_v4  ;;  %v370_v7 = vld [vmem:[#allocation9 + $0x18] sm:$0xff]   ;;  %v323_v38 = vld [vmem:[#allocation11] ss:$0 sm:$0xff] }
  0x5f   :  { %334 = vmatprep.subr.bf16.mxu0 %v526_v0  ;;  %342 = vmatprep.subr.bf16.mxu1 %v526_v0  ;;  %v311_v8 = vld [vmem:[#allocation8] ss:$0 sm:$0xff] }
  0x62   :  { %335 = vmatpush3.bf16.msra.mxu0 %v365_v2  ;;  %343 = vmatpush3.bf16.msra.mxu1 %v368_v5 }
  0x63   :  { %344 = vmatprep.subr.bf16.mxu1 %v526_v0  ;;  %v192_v30 = vld [vmem:[#allocation2] sm:$0xff]  ;;  %v193_v32 = vld [vmem:[#allocation2 + $0x8] sm:$0xff] }
  0x65   :  { %337 = vmatmul.mubr.msk.bf16.vlgmr.msra.gmra.mrb[0].mxu0 %vm90_vm0, %v366_v3 }
  0x66   :  { %345 = vmatpush3.bf16.msra.mxu1 %v369_v6 }
  0x67   :  { %346 = vmatprep.subr.bf16.mxu1 %v526_v0 }
  0x6a   :  { %347 = vmatpush3.bf16.msra.mxu1 %v370_v7 }
 0x138   :  { %v161_v9 = vpop.f32.mrb[0].mxu0 }
 0x139   :  { %v162_v10 = vadd.f32 %v311_v8, %v161_v9  ;;  %v338_v11 = vpop.f32.mrb[1].mxu0 }
 0x13a   :  { %v164_v12 = vpop.f32.mrb[2].mxu0 }
 0x13b   :  { %184 = vrot.lane.b32.xlu0 %v162_v10, %s521_s30  ;;  %v339_v13 = vpop.f32.mrb[3].mxu0  ;;  %v165_v14 = vadd.f32 %v311_v8, %v164_v12  ;;  %v316_v15 = vmul.f32 -1.442695, %v162_v10 }
 0x13d   :  { %v317_v16 = vmul.f32 -1.442695, %v165_v14  ;;  %371 = vpow2.f32 %v316_v15 }
 0x13f   :  { %186 = vrot.lane.b32.xlu0 %v165_v14, %s521_s30  ;;  %373 = vpow2.f32 %v317_v16  ;;  %s297_s30 = sshll.u32 %s528_s4, 4  ;;  %s298_s30 = int_to_ptr.vmem [resolvable:$true] %s297_s30 }
 0x140   :  { %s489_s29 = scalar_lea.vmem %s298_s30, 256  ;;  %p494_p13 = scmp.lt.s32.totalorder %s298_s30, %s298_s30 }
 0x141   :  { %p490_p12 = scmp.ne.s32.totalorder %s298_s30, %s489_s29  ;;  %p495_p0 = scmp.lt.s32.totalorder %s489_s29, %s489_s29 }
 0x143   :  { %p496_p1 = por %p495_p0, %p494_p13 }
 0x145   :  { %p497_p2 = pnand %p496_p1, %p490_p12 }
 0x147   :  { %v372_v17 = vpop.eup %371 }
 0x148   :  { %v174_v19 = vadd.f32 1.0, %v372_v17 }
 0x149   :  { %v374_v18 = vpop.eup %373 }
 0x14a   :  { %v175_v20 = vadd.f32 1.0, %v374_v18  ;;  %375 = vrcp.f32 %v174_v19 }
 0x14c   :  { %377 = vrcp.f32 %v175_v20 }
 0x154   :  { %v376_v21 = vpop.eup %375 }
 0x155   :  { %v180_v24 = vmul.f32 %v376_v21, %v162_v10 }
 0x156   :  { %v378_v22 = vpop.eup %377 }
 0x157   :  { %v181_v25 = vmul.f32 %v378_v22, %v165_v14 }
 0x1ad   :  { %v185_v23 = vpop.permute.xlu0 %184 }
 0x1ae   :  { %v190_v27 = vmul.f32 %v185_v23, %v180_v24 }
 0x1b1   :  { %v187_v26 = vpop.permute.xlu0 %186 }
 0x1b2   :  { %v191_v28 = vmul.f32 %v187_v26, %v181_v25 }
 0x1b4   :  { %v194_v29 = vpack.c.bf16 %v191_v28, %v190_v27 }
 0x1b6   :  { %349 = vmatmul.mubr.msk.bf16.vlgmr.msra.gmra.mrb[0].mxu1 %vm227_vm2, %v194_v29 }
 0x289   :  { %v265_v31 = vpop.f32.mrb[0].mxu1 }
 0x28a   :  { %v272_v33 = vadd.f32 %v265_v31, %v192_v30  ;;  %v350_v34 = vpop.f32.mrb[1].mxu1 }
 0x28b   :  { %v268_v35 = vpop.f32.mrb[2].mxu1 }
 0x28c   :  { %274 = vst.msk [vmem:[#allocation2] sm:$0xff] %vm90_vm0, %v272_v33  ;;  %v273_v36 = vadd.f32 %v268_v35, %v193_v32  ;;  %v351_v37 = vpop.f32.mrb[3].mxu1 }
 0x28e   :  { %275 = vst.msk [vmem:[#allocation2 + $0x8] sm:$0xff] %vm90_vm0, %v273_v36 }
 0x293   :  { %v279_v39 = vld [vmem:[#allocation2] sm:$0xff] }
 0x294   :  { %v288_v40 = vadd.f32 %v323_v38, %v279_v39 }
 0x295   :  { %v280_v41 = vld [vmem:[#allocation2 + $0x8] sm:$0xff] }
 0x296   :  { %v289_v42 = vadd.f32 %v323_v38, %v280_v41  ;;  %290 = vst.msk [vmem:[#allocation12] sm:$0xff] %vm90_vm0, %v288_v40 }
 0x298   :  { %291 = vst.msk [vmem:[#allocation12 + $0x8] sm:$0xff] %vm90_vm0, %v289_v42 }
 0x299   :  { %500 = shalt.err (!%p497_p2)
}
 0x29a   :  { %s501_s7 = scalar_lea.hbm %s663_s5, 256 }
 0x29b   :  { %p502_p3 = scmp.ne.s32.totalorder %s663_s5, %s501_s7  ;;  %p505_p4 = scmp.lt.u32.totalorder %s501_s7, %s663_s5 }
 0x29d   :  { %p507_p5 = pnand %p505_p4, %p502_p3 }
 0x29f   :  { %510 = shalt.err (!%p507_p5)
}
 0x2a0   :  { %s529_s12 = smov 128   ;;  %s530_s13 = smov 8  }
 0x2a1   :  { %303 = dma.vmem_to_hbm [thread:$0]  %s298_s30, 256, %s663_s5, [#allocation5], %s529_s12, %s529_s12, %s530_s13  }
 0x2a2   :  { %517 = dma.done.wait [#allocation5], 256  }
 0x2a3   :  { %518 = vsyncadd [#allocation5], 4294967040 }
 0x2a4   :  { %307 = vsyncpa [#allocation4], 1 }
 0x2a5   :  { %308 = vsyncpa [#allocation7], 1 }
 0x2a6   :  { %309 = vsyncpa [#allocation10], 1 }
 0x2a7   :  { %310 = vsyncpa [#allocation5], 1 }

</bundles_post_ra>
